<compile_context>
chip_gen: v6e
topology: v6e:2x2x1
jax: 0.10.0
libtpu: 0.0.40
codegen_flags: <defaults>
</compile_context>

<pallas_src>
import jax
import jax.numpy as jnp
from jax.experimental import pallas as pl
from jax.experimental.pallas import tpu as pltpu


def _transpose_kernel(x_ref, o_ref):
    # x_ref: (TB, TC, TL) tile; o_ref: (TB, TL, TC) tile.
    # Pure transpose, no elementwise epilogue (kernel is HBM-bandwidth bound).
    o_ref[...] = jnp.transpose(x_ref[...], (0, 2, 1))


def _block_budget_bytes():
    """Per-input-block byte target, chosen per TPU generation."""
    try:
        kind = jax.devices()[0].device_kind.lower()
    except Exception:
        kind = ""
    # v5e: ~820 GB/s HBM (DMA-bound, bigger blocks buy little) and the smallest
    # default scoped VMEM -> stay modest.  v6e/v7x: faster HBM means the fixed
    # per-grid-step cost dominates sooner, so target bigger blocks; 4 MiB still
    # keeps double-buffered in+out well under v7x's 64 MiB physical VMEM.
    if "v5" in kind:
        return 2 << 20
    if "v6" in kind or "v7" in kind or "trillium" in kind:
        return 4 << 20
    return 2 << 20


def _cdiv(a, b):
    return -(-a // b)


def _pick_block(B, C, L, itemsize, budget_bytes):
    """Pick a layout-legal (tb, tc, tl) block.

    Invariant (required for a legal layout on BOTH the (tb, tc, tl) input tile
    and the (tb, tl, tc) output tile): tc and tl are each either a multiple of
    128 or exactly the full dimension.
    """
    budget = max(budget_bytes // itemsize, 8 * 128)

    # Baseline lane-aligned tiles (full dim is always layout-legal).
    tc = C if C <= 256 else 256
    tl = L if L <= 256 else 256

    # Fold a batch factor to amortize the ~0.35 us per-grid-step overhead.
    tb = int(max(1, min(B, budget // max(tc * tl, 1))))

    # If the batch fold capped out at B, keep growing the spatial tiles toward
    # the budget.  Prefer tc (output minor dim -> wider unmasked stores and
    # longer contiguous HBM write runs), then tl.
    if tb == B:
        def fits(ntb, ntc, ntl):
            return ntb * ntc * ntl <= budget

        grew = True
        while grew:
            grew = False
            if tc % 128 == 0 and tc < min(C, 1024):
                ntc = tc + 128 if tc + 128 <= C else C  # 128-multiple or full dim
                if fits(tb, ntc, tl):
                    tc = ntc
                    grew = True
                    continue
            if tl % 128 == 0 and tl < min(L, 1024):
                ntl = tl + 128 if tl + 128 <= L else L
                if fits(tb, tc, ntl):
                    tl = ntl
                    grew = True

    # Keep at least 2 grid steps on non-trivial problems so (a) v7x's two
    # TensorCores both get work and (b) input/output DMAs of adjacent steps
    # can overlap.  Split the batch axis first (cheapest), else halve a tile.
    total_bytes = B * C * L * itemsize
    if _cdiv(B, tb) * _cdiv(C, tc) * _cdiv(L, tl) == 1 and total_bytes >= (1 << 20):
        if B >= 2:
            tb = (B + 1) // 2
        elif tc >= 256 and tc % 256 == 0:
            tc //= 2
        elif tl >= 256 and tl % 256 == 0:
            tl //= 2

    return tb, tc, tl


def transpose_layer(x, *, force_pallas=False, min_pallas_bytes=128 * 1024):
    """Equivalent of torch `x.permute(0, 2, 1)` for a 3-D array (B, C, L) -> (B, L, C)."""
    if x.ndim != 3:
        raise ValueError(f"expected a 3-D (B, C, L) input, got shape {x.shape}")
    B, C, L = x.shape
    itemsize = jnp.dtype(x.dtype).itemsize
    total_bytes = B * C * L * itemsize

    # TODO(synk): at the model's real call site (C ~ 8, a few KiB total) this
    # permute should be fused into the consumer (swap dot_general dimension
    # numbers) or left to XLA's native transpose; a standalone kernel there is
    # pure launch/pipeline overhead and the (B, L, C<128) output is lane-sparse
    # (masked vst + padded minor dim), wasting up to 16x store bandwidth.
    if not force_pallas and total_bytes < min_pallas_bytes:
        return jnp.transpose(x, (0, 2, 1))

    budget_bytes = _block_budget_bytes()
    tb, tc, tl = _pick_block(B, C, L, itemsize, budget_bytes)

    gb, gc, gl = pl.cdiv(B, tb), pl.cdiv(C, tc), pl.cdiv(L, tl)
    grid = (gb, gc, gl)
    n_steps = gb * gc * gl

    block_in_bytes = tb * tc * tl * itemsize

    # Deeper input pipelining only pays when the grid is long and the block is
    # at the small end of the budget (the body is a single XLU transpose, so
    # there is nothing else to hide the DMA behind).
    use_deep_pipeline = (n_steps >= 4) and (2 * block_in_bytes <= budget_bytes)
    if use_deep_pipeline:
        in_spec = pl.BlockSpec((tb, tc, tl), lambda b, i, j: (b, i, j),
                               pipeline_mode=pl.Buffered(3))
        n_in_buffers = 3
    else:
        in_spec = pl.BlockSpec((tb, tc, tl), lambda b, i, j: (b, i, j))
        n_in_buffers = 2

    # Explicit scoped-VMEM limit sized from the live buffers (in + out, each
    # multi-buffered) with 2x headroom; the 40 MiB cap keeps it legal on v7x
    # (64 MiB physical) while the 16 MiB floor matches v5e's default.
    live_bytes = (n_in_buffers + 2) * block_in_bytes
    vmem_limit = int(min(40 << 20, max(16 << 20, 2 * live_bytes + (4 << 20))))

    return pl.pallas_call(
        _transpose_kernel,
        out_shape=jax.ShapeDtypeStruct((B, L, C), x.dtype),
        grid_spec=pltpu.PrefetchScalarGridSpec(
            num_scalar_prefetch=0,
            grid=grid,
            in_specs=[in_spec],
            out_specs=pl.BlockSpec((tb, tl, tc), lambda b, i, j: (b, j, i)),
        ),
        compiler_params=pltpu.CompilerParams(
            dimension_semantics=("parallel", "parallel", "parallel"),
            vmem_limit_bytes=vmem_limit,
        ),
    )(x)


if __name__ == "__main__":
    key = jax.random.PRNGKey(0)
    k1, k2, k3 = jax.random.split(key, 3)

    # 1) The model's typical tiny shape (B, C, L) = (2, 8, 128).  The default
    #    wrapper hands this to XLA (standalone kernel = pure overhead); force
    #    the Pallas path here so the kernel itself is exercised and checked.
    x1 = jax.random.normal(k1, (2, 8, 128), dtype=jnp.float32)
    out1 = jax.block_until_ready(transpose_layer(x1, force_pallas=True))
    ref1 = jnp.transpose(x1, (0, 2, 1))
    assert out1.shape == (2, 128, 8) and out1.dtype == x1.dtype
    assert jnp.array_equal(out1, ref1), "mismatch vs. reference transpose"
    # Default dispatch (XLA fallback for tiny inputs) must agree bit-exactly.
    assert jnp.array_equal(jax.block_until_ready(transpose_layer(x1)), ref1)

    # 2) Edge-block path: C grown to the full non-128-multiple dim, full-dim L.
    x2 = jax.random.normal(k2, (2, 300, 200), dtype=jnp.float32)
    out2 = jax.block_until_ready(transpose_layer(x2))
    assert jnp.array_equal(out2, jnp.transpose(x2, (0, 2, 1))), "edge-tile mismatch"

    # 3) Multi-step grid: batch axis re-split so >=2 blocks remain available
    #    for the v7x two-TensorCore split / pipeline overlap.
    x3 = jax.random.normal(k3, (2, 512, 384), dtype=jnp.float32)
    out3 = jax.block_until_ready(transpose_layer(x3))
    assert jnp.array_equal(out3, jnp.transpose(x3, (0, 2, 1))), "multi-step mismatch"

    print("KERNEL_OK")
</pallas_src>

<mosaic_0001>
module attributes {stable_mosaic.version = 11 : i64} {
  func.func @_transpose_kernel(%arg0: i32, %arg1: i32, %arg2: i32, %arg3: memref<2x8x128xf32, #tpu.memory_space<vmem>>, %arg4: memref<2x128x8xf32, #tpu.memory_space<vmem>>) attributes {dimension_semantics = [#tpu.dimension_semantics<parallel>, #tpu.dimension_semantics<parallel>, #tpu.dimension_semantics<parallel>], iteration_bounds = array<i64: 1, 1, 1>, scalar_prefetch = 0 : i64, scratch_operands = 0 : i64, tpu.core_type = #tpu.core_type<tc>, window_params = [{transform_indices = @transform_0, window_bounds = array<i64: 2, 8, 128>}, {transform_indices = @transform_1, window_bounds = array<i64: 2, 128, 8>}]} {
    %c0 = arith.constant 0 : index
    %c0_0 = arith.constant 0 : index
    %c0_1 = arith.constant 0 : index
    %0 = vector.load %arg3[%c0, %c0_0, %c0_1] : memref<2x8x128xf32, #tpu.memory_space<vmem>>, vector<2x8x128xf32>
    %1 = tpu.transpose %0, [0, 2, 1] : vector<2x8x128xf32> -> vector<2x128x8xf32>
    %c0_2 = arith.constant 0 : index
    %c0_3 = arith.constant 0 : index
    %c0_4 = arith.constant 0 : index
    %2 = vector.load %arg4[%c0_2, %c0_3, %c0_4] : memref<2x128x8xf32, #tpu.memory_space<vmem>>, vector<2x128x8xf32>
    tpu.vector_store %arg4[%c0_2, %c0_3, %c0_4], %1 {strides = array<i32>} : memref<2x128x8xf32, #tpu.memory_space<vmem>>, vector<2x128x8xf32>,
    return
  }
  func.func @transform_0(%arg0: i32, %arg1: i32, %arg2: i32) -> (i32, i32, i32) {
    %c0_i32 = arith.constant 0 : i32
    return %arg0, %arg1, %arg2 : i32, i32, i32
  }
  func.func @transform_1(%arg0: i32, %arg1: i32, %arg2: i32) -> (i32, i32, i32) {
    %c0_i32 = arith.constant 0 : i32
    return %arg0, %arg2, %arg1 : i32, i32, i32
  }
}

</mosaic_0001>

<bundles_post_ra>
// kernel: tpu_custom_call.1
= control target key start
LH: loop header
LB: loop body
LE: loop exit
PB: predicated region body
PF: predicated region fallthrough
CT: control target
= control target key end

     0   :  { %6 = vsyncpa [#allocation3], 0  ;;  %s152_s6 = smov [#allocation2]   ;;  %s296_s0 = inlined_call_operand.hbm [shape: f32[2,8,128], index: 0, kind: input, shape index: {}]   ;;  %s297_s1 = inlined_call_operand.vmem [shape: f32[2,128,8], index: 1, kind: output, shape index: {}]  }
   0x1   :  { %s12_s7 = sshll.u32 %s152_s6, 4  ;;  %s13_s7 = int_to_ptr.vmem [resolvable:$true] %s12_s7 }
   0x2   :  { %s138_s8 = scalar_lea.vmem %s13_s7, 256  ;;  %p143_p1 = scmp.lt.s32.totalorder %s13_s7, %s13_s7 }
   0x3   :  { %p139_p0 = scmp.ne.s32.totalorder %s13_s7, %s138_s8  ;;  %p144_p2 = scmp.lt.s32.totalorder %s138_s8, %s138_s8 }
   0x5   :  { %p145_p3 = por %p144_p2, %p143_p1 }
   0x7   :  { %p146_p4 = pnand %p145_p3, %p139_p0 }
   0x9   :  { %149 = shalt.err (!%p146_p4)
}
   0xa   :  { %s153_s9 = smov 128   ;;  %s154_s10 = smov 8  }
   0xb   :  { %18 = dma.hbm_to_vmem [thread:$0]  %s296_s0, 256, %s13_s7, [#allocation3], %s153_s9, %s153_s9, %s154_s10  }
   0xc   :  { %150 = dma.done.wait [#allocation3], 256  }
   0xd   :  { %151 = vsyncadd [#allocation3], 4294967040  ;;  %v22_v0 = vld [vmem:[#allocation2] sm:$0xff]  ;;  %v23_v1 = vld [vmem:[#allocation2 + $0x8] sm:$0xff]  ;;  %vm88_vm0 = vcmask 64512  }
   0xe   :  { %24 = vxpose.xlu0.b32.start.end [1/1] (short) %v22_v0, 128 }
  0x4b   :  { %56 = vxpose.xlu0.b32.start.end [1/1] (short) %v23_v1, 128 }
  0x8a   :  { %v40_v2 = vpop.trf.xlu0 }
  0x8b   :  { %89 = vst.msk [vmem:[%s297_s1] sm:$0xff] %vm88_vm0, %v40_v2 }
  0x8e   :  { %v41_v3 = vpop.trf.xlu0 }
  0x8f   :  { %90 = vst.msk [vmem:[%s297_s1 + $0x8] sm:$0xff] %vm88_vm0, %v41_v3 }
  0x92   :  { %v42_v4 = vpop.trf.xlu0 }
  0x93   :  { %91 = vst.msk [vmem:[%s297_s1 + $0x10] sm:$0xff] %vm88_vm0, %v42_v4 }
  0x96   :  { %v43_v5 = vpop.trf.xlu0 }
  0x97   :  { %92 = vst.msk [vmem:[%s297_s1 + $0x18] sm:$0xff] %vm88_vm0, %v43_v5 }
  0x9a   :  { %v44_v6 = vpop.trf.xlu0 }
  0x9b   :  { %93 = vst.msk [vmem:[%s297_s1 + $0x20] sm:$0xff] %vm88_vm0, %v44_v6 }
  0x9e   :  { %v45_v7 = vpop.trf.xlu0 }
  0x9f   :  { %94 = vst.msk [vmem:[%s297_s1 + $0x28] sm:$0xff] %vm88_vm0, %v45_v7 }
  0xa2   :  { %v46_v8 = vpop.trf.xlu0 }
  0xa3   :  { %95 = vst.msk [vmem:[%s297_s1 + $0x30] sm:$0xff] %vm88_vm0, %v46_v8 }
  0xa6   :  { %v47_v9 = vpop.trf.xlu0 }
  0xa7   :  { %96 = vst.msk [vmem:[%s297_s1 + $0x38] sm:$0xff] %vm88_vm0, %v47_v9 }
  0xaa   :  { %v48_v10 = vpop.trf.xlu0 }
  0xab   :  { %97 = vst.msk [vmem:[%s297_s1 + $0x40] sm:$0xff] %vm88_vm0, %v48_v10 }
  0xae   :  { %v49_v11 = vpop.trf.xlu0 }
  0xaf   :  { %98 = vst.msk [vmem:[%s297_s1 + $0x48] sm:$0xff] %vm88_vm0, %v49_v11 }
  0xb2   :  { %v50_v12 = vpop.trf.xlu0 }
  0xb3   :  { %99 = vst.msk [vmem:[%s297_s1 + $0x50] sm:$0xff] %vm88_vm0, %v50_v12 }
  0xb6   :  { %v51_v13 = vpop.trf.xlu0 }
  0xb7   :  { %100 = vst.msk [vmem:[%s297_s1 + $0x58] sm:$0xff] %vm88_vm0, %v51_v13 }
  0xba   :  { %v52_v14 = vpop.trf.xlu0 }
  0xbb   :  { %101 = vst.msk [vmem:[%s297_s1 + $0x60] sm:$0xff] %vm88_vm0, %v52_v14 }
  0xbe   :  { %v53_v15 = vpop.trf.xlu0 }
  0xbf   :  { %102 = vst.msk [vmem:[%s297_s1 + $0x68] sm:$0xff] %vm88_vm0, %v53_v15 }
  0xc2   :  { %v54_v16 = vpop.trf.xlu0 }
  0xc3   :  { %103 = vst.msk [vmem:[%s297_s1 + $0x70] sm:$0xff] %vm88_vm0, %v54_v16 }
  0xc6   :  { %v55_v17 = vpop.trf.xlu0 }
  0xc7   :  { %104 = vst.msk [vmem:[%s297_s1 + $0x78] sm:$0xff] %vm88_vm0, %v55_v17 }
  0xca   :  { %v72_v18 = vpop.trf.xlu0 }
  0xcb   :  { %105 = vst.msk [vmem:[%s297_s1 + $0x80] sm:$0xff] %vm88_vm0, %v72_v18 }
  0xce   :  { %v73_v19 = vpop.trf.xlu0 }
  0xcf   :  { %106 = vst.msk [vmem:[%s297_s1 + $0x88] sm:$0xff] %vm88_vm0, %v73_v19 }
  0xd2   :  { %v74_v20 = vpop.trf.xlu0 }
  0xd3   :  { %107 = vst.msk [vmem:[%s297_s1 + $0x90] sm:$0xff] %vm88_vm0, %v74_v20 }
  0xd6   :  { %v75_v21 = vpop.trf.xlu0 }
  0xd7   :  { %108 = vst.msk [vmem:[%s297_s1 + $0x98] sm:$0xff] %vm88_vm0, %v75_v21 }
  0xda   :  { %v76_v22 = vpop.trf.xlu0 }
  0xdb   :  { %109 = vst.msk [vmem:[%s297_s1 + $0xa0] sm:$0xff] %vm88_vm0, %v76_v22 }
  0xde   :  { %v77_v23 = vpop.trf.xlu0 }
  0xdf   :  { %110 = vst.msk [vmem:[%s297_s1 + $0xa8] sm:$0xff] %vm88_vm0, %v77_v23 }
  0xe2   :  { %v78_v24 = vpop.trf.xlu0 }
  0xe3   :  { %111 = vst.msk [vmem:[%s297_s1 + $0xb0] sm:$0xff] %vm88_vm0, %v78_v24 }
  0xe6   :  { %v79_v25 = vpop.trf.xlu0 }
  0xe7   :  { %112 = vst.msk [vmem:[%s297_s1 + $0xb8] sm:$0xff] %vm88_vm0, %v79_v25 }
  0xea   :  { %v80_v26 = vpop.trf.xlu0 }
  0xeb   :  { %113 = vst.msk [vmem:[%s297_s1 + $0xc0] sm:$0xff] %vm88_vm0, %v80_v26 }
  0xee   :  { %v81_v27 = vpop.trf.xlu0 }
  0xef   :  { %114 = vst.msk [vmem:[%s297_s1 + $0xc8] sm:$0xff] %vm88_vm0, %v81_v27 }
  0xf2   :  { %v82_v28 = vpop.trf.xlu0 }
  0xf3   :  { %115 = vst.msk [vmem:[%s297_s1 + $0xd0] sm:$0xff] %vm88_vm0, %v82_v28 }
  0xf6   :  { %v83_v29 = vpop.trf.xlu0 }
  0xf7   :  { %116 = vst.msk [vmem:[%s297_s1 + $0xd8] sm:$0xff] %vm88_vm0, %v83_v29 }
  0xfa   :  { %v84_v30 = vpop.trf.xlu0 }
  0xfb   :  { %117 = vst.msk [vmem:[%s297_s1 + $0xe0] sm:$0xff] %vm88_vm0, %v84_v30 }
  0xfe   :  { %v85_v31 = vpop.trf.xlu0 }
  0xff   :  { %118 = vst.msk [vmem:[%s297_s1 + $0xe8] sm:$0xff] %vm88_vm0, %v85_v31 }
 0x102   :  { %v86_v32 = vpop.trf.xlu0 }
 0x103   :  { %119 = vst.msk [vmem:[%s297_s1 + $0xf0] sm:$0xff] %vm88_vm0, %v86_v32 }
 0x106   :  { %v87_v33 = vpop.trf.xlu0 }
 0x107   :  { %120 = vst.msk [vmem:[%s297_s1 + $0xf8] sm:$0xff] %vm88_vm0, %v87_v33 }
 0x108   :  { %125 = vsyncpa [#allocation3], 1 }

</bundles_post_ra>
